<compile_context>
chip_gen: v5e
topology: v5e:2x2
jax: 0.10.0
libtpu: 0.0.40
codegen_flags: <defaults>
</compile_context>

<pallas_src>
import functools
import math

import jax
import jax.numpy as jnp
from jax import lax
from jax.experimental import pallas as pl
from jax.experimental.pallas import tpu as pltpu


def _yolo_loss_kernel(pred_ref, targ_ref, out_ref, acc_ref, *,
                      n_rows, lane_tile, steps, w_box, w_obj, w_cls):
    c = pl.program_id(0)   # shard (maps to a TensorCore on megacore parts)
    s = pl.program_id(1)   # streaming step along rows (reduction axis)

    @pl.when(s == 0)
    def _init():
        acc_ref[...] = jnp.zeros_like(acc_ref)

    p = pred_ref[...].astype(jnp.float32)   # (C, L), channel-major, lane-dense
    t = targ_ref[...].astype(jnp.float32)

    n_ch = p.shape[0]
    ch = lax.broadcasted_iota(jnp.int32, (n_ch, 1), 0)   # channel id per sublane
    is_box = ch < 4
    is_cls = ch >= 5

    # BCE-with-logits targets: class targets go through .long().float()
    # (truncation toward zero); the objectness target is used as-is.
    t_trunc = jnp.where(t >= 0.0, jnp.floor(t), jnp.ceil(t))
    t_bce = jnp.where(is_cls, t_trunc, t)

    # Per-element losses computed lane-dense over the whole tile, selected per
    # channel group (rows 0..3 -> squared error, rows 4.. -> BCE with logits).
    sq = (p - t) * (p - t)
    bce = (jnp.maximum(p, 0.0) - p * t_bce
           + jnp.log(1.0 + jnp.exp(-jnp.abs(p))))
    elem = jnp.where(is_box, sq, bce)

    # Mask off the zero-padded columns beyond the real batch*grid extent.
    col = (c * steps + s) * lane_tile + lax.broadcasted_iota(
        jnp.int32, (1, lane_tile), 1)
    elem = jnp.where(col < n_rows, elem, 0.0)

    # Vector-shaped accumulator: elementwise VPU adds only in the hot loop.
    acc_ref[...] += elem

    @pl.when(s == steps - 1)
    def _finalize():
        # One-time cross-lane reduction + per-channel weighting/normalization.
        ch_sums = jnp.sum(acc_ref[...], axis=1, keepdims=True)          # (C, 1)
        w = jnp.where(is_box, w_box, jnp.where(ch == 4, w_obj, w_cls))  # (C, 1)
        partial = jnp.sum(ch_sums * w, axis=0, keepdims=True)           # (1, 1)
        out_ref[...] = jnp.broadcast_to(partial[:, None, :], out_ref.shape)


def yolo_loss(predictions, targets, *, box_weight=0.05, obj_weight=1.0,
              cls_weight=0.5, lane_tile=2048, num_shards=2):
    """predictions, targets: (..., 5 + num_classes); returns scalar loss."""
    assert predictions.shape == targets.shape
    C = predictions.shape[-1]
    assert C > 5, "channel dim must be 5 + num_classes with num_classes >= 1"
    num_cls = C - 5
    R = int(math.prod(predictions.shape[:-1]))

    # Channel-major (C, R): rows become the 128-lane-dense axis.
    pred_cm = predictions.reshape(R, C).astype(jnp.float32).T
    targ_cm = targets.reshape(R, C).astype(jnp.float32).T

    # Lane tile: multiple of 128, no larger than needed for this R.
    lane_tile = max(128, (int(lane_tile) // 128) * 128)
    L = min(lane_tile, pl.cdiv(R, 128) * 128)
    blocks = pl.cdiv(pl.cdiv(R, L), num_shards) * num_shards
    steps = blocks // num_shards
    R_pad = blocks * L
    if R_pad != R:
        pad = ((0, 0), (0, R_pad - R))
        pred_cm = jnp.pad(pred_cm, pad)
        targ_cm = jnp.pad(targ_cm, pad)

    kernel = functools.partial(
        _yolo_loss_kernel,
        n_rows=R,
        lane_tile=L,
        steps=steps,
        # Fold the 'mean' normalization of each loss term into its weight.
        w_box=float(box_weight) / (R * 4.0),
        w_obj=float(obj_weight) / float(R),
        w_cls=float(cls_weight) / (R * float(num_cls)),
    )

    out = pl.pallas_call(
        kernel,
        out_shape=jax.ShapeDtypeStruct((num_shards, 1, 128), jnp.float32),
        grid_spec=pltpu.PrefetchScalarGridSpec(
            num_scalar_prefetch=0,
            grid=(num_shards, steps),
            in_specs=[
                pl.BlockSpec((C, L), lambda c, s: (0, c * steps + s)),
                pl.BlockSpec((C, L), lambda c, s: (0, c * steps + s)),
            ],
            out_specs=pl.BlockSpec((1, 1, 128), lambda c, s: (c, 0, 0)),
            scratch_shapes=[pltpu.VMEM((C, L), jnp.float32)],
        ),
        compiler_params=pltpu.CompilerParams(
            dimension_semantics=("parallel", "arbitrary")),
    )(pred_cm, targ_cm)

    # Per-shard partial losses (all 128 lanes of each row are identical).
    return jnp.sum(out[:, 0, 0])


def _reference_loss(pred, targ, box_weight=0.05, obj_weight=1.0, cls_weight=0.5):
    pb = pred[..., :4]
    po = pred[..., 4]
    pc = pred[..., 5:]
    tb = targ[..., :4]
    to = targ[..., 4]
    tc = jnp.trunc(targ[..., 5:])   # .long().float() == truncate toward zero

    def bce_with_logits(x, t):
        return jnp.mean(-(t * jax.nn.log_sigmoid(x)
                          + (1.0 - t) * jax.nn.log_sigmoid(-x)))

    box = jnp.mean((pb - tb) ** 2)
    obj = bce_with_logits(po, to)
    cls = bce_with_logits(pc, tc)
    return box_weight * box + obj_weight * obj + cls_weight * cls


if __name__ == "__main__":
    # Small shapes consistent with the module: batch=2, 8x8 grid -> 64 cells,
    # 13 channels => num_classes = 8.
    B, GH, GW, NC = 2, 8, 8, 8
    G = GH * GW

    key = jax.random.PRNGKey(0)
    k1, k2, k3, k4 = jax.random.split(key, 4)

    predictions = jax.random.normal(k1, (B, G, 5 + NC), dtype=jnp.float32)

    # Targets: boxes in [0, 1), obj conf in {0, 1}, class targets in [0, 2)
    # (exercises the .long().float() truncation path).
    conf = (jax.random.uniform(k2, (B, G)) > 0.7).astype(jnp.float32)
    boxes = jax.random.uniform(k3, (B, G, 4), dtype=jnp.float32)
    classes = jax.random.uniform(k4, (B, G, NC), minval=0.0, maxval=2.0,
                                 dtype=jnp.float32)
    targets = jnp.concatenate([boxes, conf[..., None], classes], axis=-1)

    loss_fn = jax.jit(lambda p, t: yolo_loss(p, t))
    loss = jax.block_until_ready(loss_fn(predictions, targets))

    ref = jax.block_until_ready(_reference_loss(predictions, targets))

    assert jnp.isfinite(loss), "kernel loss is not finite"
    assert jnp.allclose(loss, ref, rtol=1e-5, atol=1e-6), (loss, ref)

    print("KERNEL_OK")
</pallas_src>

<mosaic_0001>
module attributes {stable_mosaic.version = 11 : i64} {
  func.func @_yolo_loss_kernel(%arg0: i32, %arg1: i32, %arg2: memref<13x128xf32, #tpu.memory_space<vmem>>, %arg3: memref<13x128xf32, #tpu.memory_space<vmem>>, %arg4: memref<1x1x128xf32, #tpu.memory_space<vmem>>, %arg5: memref<13x128xf32, #tpu.memory_space<vmem>>) attributes {dimension_semantics = [#tpu.dimension_semantics<parallel>, #tpu.dimension_semantics<arbitrary>], iteration_bounds = array<i64: 2, 1>, scalar_prefetch = 0 : i64, scratch_operands = 1 : i64, tpu.core_type = #tpu.core_type<tc>, window_params = [{transform_indices = @transform_0, window_bounds = array<i64: 13, 128>}, {transform_indices = @transform_1, window_bounds = array<i64: 13, 128>}, {transform_indices = @transform_2, window_bounds = array<i64: 1, 1, 128>}]} {
    %c0_i32 = arith.constant 0 : i32
    %0 = arith.cmpi eq, %arg1, %c0_i32 : i32
    %1 = arith.extui %0 : i1 to i32
    %c0_i32_0 = arith.constant 0 : i32
    %2 = arith.cmpi ne, %1, %c0_i32_0 : i32
    scf.if %2 {
      %cst_15 = arith.constant 0.000000e+00 : f32
      %54 = vector.broadcast %cst_15 : f32 to vector<13x128xf32>
      %c0_16 = arith.constant 0 : index
      %c0_17 = arith.constant 0 : index
      %55 = vector.load %arg5[%c0_16, %c0_17] : memref<13x128xf32, #tpu.memory_space<vmem>>, vector<13x128xf32>
      tpu.vector_store %arg5[%c0_16, %c0_17], %54 {strides = array<i32>} : memref<13x128xf32, #tpu.memory_space<vmem>>, vector<13x128xf32>,
    } else {
    }
    %c0 = arith.constant 0 : index
    %c0_1 = arith.constant 0 : index
    %3 = vector.load %arg2[%c0, %c0_1] : memref<13x128xf32, #tpu.memory_space<vmem>>, vector<13x128xf32>
    %c0_2 = arith.constant 0 : index
    %c0_3 = arith.constant 0 : index
    %4 = vector.load %arg3[%c0_2, %c0_3] : memref<13x128xf32, #tpu.memory_space<vmem>>, vector<13x128xf32>
    %5 = tpu.iota {dimensions = array<i32: 0>} : vector<13x1xi32>
    %c4_i32 = arith.constant 4 : i32
    %6 = vector.broadcast %c4_i32 : i32 to vector<13x1xi32>
    %7 = arith.cmpi slt, %5, %6 : vector<13x1xi32>
    %c5_i32 = arith.constant 5 : i32
    %8 = vector.broadcast %c5_i32 : i32 to vector<13x1xi32>
    %9 = arith.cmpi sge, %5, %8 : vector<13x1xi32>
    %cst = arith.constant 0.000000e+00 : f32
    %10 = vector.broadcast %cst : f32 to vector<13x128xf32>
    %11 = arith.cmpf oge, %4, %10 : vector<13x128xf32>
    %12 = math.floor %4 : vector<13x128xf32>
    %13 = math.ceil %4 : vector<13x128xf32>
    %14 = arith.select %11, %12, %13 : vector<13x128xi1>, vector<13x128xf32>
    %15 = vector.shape_cast %9 : vector<13x1xi1> to vector<13x1xi1>
    %16 = vector.broadcast %15 : vector<13x1xi1> to vector<13x128xi1>
    %17 = arith.select %16, %14, %4 : vector<13x128xi1>, vector<13x128xf32>
    %18 = arith.subf %3, %4 : vector<13x128xf32>
    %19 = arith.subf %3, %4 : vector<13x128xf32>
    %20 = arith.mulf %18, %19 : vector<13x128xf32>
    %cst_4 = arith.constant 0.000000e+00 : f32
    %21 = vector.broadcast %cst_4 : f32 to vector<13x128xf32>
    %22 = arith.maximumf %3, %21 : vector<13x128xf32>
    %23 = arith.mulf %3, %17 : vector<13x128xf32>
    %24 = arith.subf %22, %23 : vector<13x128xf32>
    %25 = math.absf %3 : vector<13x128xf32>
    %cst_5 = arith.constant 0.000000e+00 : f32
    %26 = vector.broadcast %cst_5 : f32 to vector<13x128xf32>
    %27 = arith.subf %26, %25 : vector<13x128xf32>
    %28 = math.exp %27 : vector<13x128xf32>
    %cst_6 = arith.constant 1.000000e+00 : f32
    %29 = vector.broadcast %cst_6 : f32 to vector<13x128xf32>
    %30 = arith.addf %29, %28 : vector<13x128xf32>
    %31 = math.log %30 : vector<13x128xf32>
    %32 = arith.addf %24, %31 : vector<13x128xf32>
    %33 = vector.shape_cast %7 : vector<13x1xi1> to vector<13x1xi1>
    %34 = vector.broadcast %33 : vector<13x1xi1> to vector<13x128xi1>
    %35 = arith.select %34, %20, %32 : vector<13x128xi1>, vector<13x128xf32>
    %c1_i32 = arith.constant 1 : i32
    %36 = arith.muli %arg0, %c1_i32 : i32
    %37 = arith.addi %36, %arg1 : i32
    %c128_i32 = arith.constant 128 : i32
    %38 = arith.muli %37, %c128_i32 : i32
    %39 = tpu.iota {dimensions = array<i32: 1>} : vector<1x128xi32>
    %40 = vector.broadcast %38 : i32 to vector<1x128xi32>
    %41 = arith.addi %40, %39 : vector<1x128xi32>
    %c128_i32_7 = arith.constant 128 : i32
    %42 = vector.broadcast %c128_i32_7 : i32 to vector<1x128xi32>
    %43 = arith.cmpi slt, %41, %42 : vector<1x128xi32>
    %cst_8 = arith.constant 0.000000e+00 : f32
    %44 = vector.shape_cast %43 : vector<1x128xi1> to vector<1x128xi1>
    %45 = vector.broadcast %44 : vector<1x128xi1> to vector<13x128xi1>
    %46 = vector.broadcast %cst_8 : f32 to vector<13x128xf32>
    %47 = arith.select %45, %35, %46 : vector<13x128xi1>, vector<13x128xf32>
    %c0_9 = arith.constant 0 : index
    %c0_10 = arith.constant 0 : index
    %48 = vector.load %arg5[%c0_9, %c0_10] : memref<13x128xf32, #tpu.memory_space<vmem>>, vector<13x128xf32>
    %49 = arith.addf %48, %47 : vector<13x128xf32>
    %c0_11 = arith.constant 0 : index
    %c0_12 = arith.constant 0 : index
    %50 = vector.load %arg5[%c0_11, %c0_12] : memref<13x128xf32, #tpu.memory_space<vmem>>, vector<13x128xf32>
    tpu.vector_store %arg5[%c0_11, %c0_12], %49 {strides = array<i32>} : memref<13x128xf32, #tpu.memory_space<vmem>>, vector<13x128xf32>,
    %c0_i32_13 = arith.constant 0 : i32
    %51 = arith.cmpi eq, %arg1, %c0_i32_13 : i32
    %52 = arith.extui %51 : i1 to i32
    %c0_i32_14 = arith.constant 0 : i32
    %53 = arith.cmpi ne, %52, %c0_i32_14 : i32
    scf.if %53 {
      %c0_15 = arith.constant 0 : index
      %c0_16 = arith.constant 0 : index
      %54 = vector.load %arg5[%c0_15, %c0_16] : memref<13x128xf32, #tpu.memory_space<vmem>>, vector<13x128xf32>
      %cst_17 = arith.constant dense<0.000000e+00> : vector<13xf32>
      %55 = vector.multi_reduction <add>, %54, %cst_17 [1] : vector<13x128xf32> to vector<13xf32>
      %56 = vector.shape_cast %55 : vector<13xf32> to vector<13x1xf32>
      %c4_i32_18 = arith.constant 4 : i32
      %57 = vector.broadcast %c4_i32_18 : i32 to vector<13x1xi32>
      %58 = arith.cmpi eq, %5, %57 : vector<13x1xi32>
      %cst_19 = arith.constant 7.812500e-03 : f32
      %cst_20 = arith.constant 4.8828125E-4 : f32
      %59 = vector.broadcast %cst_19 : f32 to vector<13x1xf32>
      %60 = vector.broadcast %cst_20 : f32 to vector<13x1xf32>
      %61 = arith.select %58, %59, %60 : vector<13x1xi1>, vector<13x1xf32>
      %cst_21 = arith.constant 9.76562514E-5 : f32
      %62 = vector.broadcast %cst_21 : f32 to vector<13x1xf32>
      %63 = arith.select %7, %62, %61 : vector<13x1xi1>, vector<13x1xf32>
      %64 = arith.mulf %56, %63 : vector<13x1xf32>
      %cst_22 = arith.constant dense<0.000000e+00> : vector<1xf32>
      %65 = vector.multi_reduction <add>, %64, %cst_22 [0] : vector<13x1xf32> to vector<1xf32>
      %66 = vector.shape_cast %65 : vector<1xf32> to vector<1x1xf32>
      %67 = vector.shape_cast %66 : vector<1x1xf32> to vector<1x1x1xf32>
      %68 = vector.shape_cast %67 : vector<1x1x1xf32> to vector<1x1x1xf32>
      %69 = vector.broadcast %68 : vector<1x1x1xf32> to vector<1x1x128xf32>
      %c0_23 = arith.constant 0 : index
      %c0_24 = arith.constant 0 : index
      %c0_25 = arith.constant 0 : index
      %70 = vector.load %arg4[%c0_23, %c0_24, %c0_25] : memref<1x1x128xf32, #tpu.memory_space<vmem>>, vector<1x1x128xf32>
      tpu.vector_store %arg4[%c0_23, %c0_24, %c0_25], %69 {strides = array<i32>} : memref<1x1x128xf32, #tpu.memory_space<vmem>>, vector<1x1x128xf32>,
    } else {
    }
    return
  }
  func.func @transform_0(%arg0: i32, %arg1: i32) -> (i32, i32) {
    %c1_i32 = arith.constant 1 : i32
    %0 = arith.muli %arg0, %c1_i32 : i32
    %1 = arith.addi %0, %arg1 : i32
    %c0_i32 = arith.constant 0 : i32
    %c0_i32_0 = arith.constant 0 : i32
    return %c0_i32, %1 : i32, i32
  }
  func.func @transform_1(%arg0: i32, %arg1: i32) -> (i32, i32) {
    %c1_i32 = arith.constant 1 : i32
    %0 = arith.muli %arg0, %c1_i32 : i32
    %1 = arith.addi %0, %arg1 : i32
    %c0_i32 = arith.constant 0 : i32
    %c0_i32_0 = arith.constant 0 : i32
    return %c0_i32, %1 : i32, i32
  }
  func.func @transform_2(%arg0: i32, %arg1: i32) -> (i32, i32, i32) {
    %c0_i32 = arith.constant 0 : i32
    %c0_i32_0 = arith.constant 0 : i32
    %c0_i32_1 = arith.constant 0 : i32
    return %arg0, %c0_i32, %c0_i32_0 : i32, i32, i32
  }
}

</mosaic_0001>

<bundles_post_ra>
// kernel: _lambda_.1
= control target key start
LH: loop header
LB: loop body
LE: loop exit
PB: predicated region body
PF: predicated region fallthrough
CT: control target
= control target key end

     0   :  { %s568_s9 = smov 0   ;;  %s570_s10 = smov 0   ;;  %s650_s0 = inlined_call_operand.vmem [shape: f32[13,256], index: 0, kind: input, shape index: {}]   ;;  %s651_s1 = inlined_call_operand.vmem [shape: f32[13,256], index: 1, kind: input, shape index: {}]   ;;  %s652_s2 = inlined_call_operand.vmem [shape: f32[2,1,128], index: 2, kind: output, shape index: {}]  }
   0x1   :  { %s572_s11 = smov 0   ;;  %s574_s12 = smov 0  }
   0x2   :  { %s576_s13 = smov 0  }
   0x3 LB: > { %s24_s14 = sadd.s32 1, %s545_s12  ;;  %p40_p1 = scmp.ne.s32.totalorder %s537_s10, %s533_s9  ;;  %s549_s13 = sphi %s576_s13, %s12_s13   ;;  %s545_s12 = sphi %s574_s12, %s657_s12   ;;  %s541_s11 = sphi %s572_s11, %s656_s11   ;;  %s537_s10 = sphi %s570_s10, %s655_s10   ;;  %s533_s9 = sphi %s568_s9, %s654_s9  }
   0x4   : > { %p26_p0 = scmp.ge.s32.totalorder %s24_s14, 2  ;;  %p41_p2 = scmp.eq.s32.totalorder %s549_s13, 0 }
   0x5   : > { %s33_s17 = sadd.s32 1, %s537_s10  ;;  %p450_p5 = scmp.ge.s32.totalorder %s549_s13, 2 }
   0x6   : > { %s659_s14 = smov (%p26_p0, %s24_s14), 0  ;;  %p599_p3 = por %p41_p2, %p40_p1 }
   0x7   : > { %s30_s16 = ssub.s32 %s545_s12, %s659_s14  ;;  %120 = sbr.rel (%p450_p5) target bundleno = 24 (0x18), region = 16 }
   0x8   : > { %p31_p4 = scmp.eq.s32.totalorder %s30_s16, 0 }
   0xa   : > { %s607_s18 = scalar_select %p31_p4, %s537_s10, %s33_s17  }
   0xc   : > { %123 = sbr.rel (!%p599_p3) target bundleno = 18 (0x12), region = 20  ;;  %s125_s19 = sand.u32 (%p599_p3), 1, %s537_s10  }
   0xd   : > { %s452_s20 = sshll.u32 (%p599_p3), %s545_s12, 3  ;;  %s451_s21 = sshll.u32 (%p599_p3), %s125_s19, 4 }
   0xe   : > { %s130_s24 = scalar_lea.vmem (%p599_p3), %s650_s0, %s452_s20  ;;  %s127_s25 = scalar_lea.vmem (%p599_p3), [#allocation3], %s451_s21 }
   0xf   : > { %v161_v0 = vld [vmem:[%s130_s24] sm:$0xff] (%p599_p3)  ;;  %v163_v1 = vld [vmem:[%s130_s24 + $0x10] sm:$0xff] (%p599_p3) }
  0x10   : > { %162 = vst [vmem:[%s127_s25] sm:$0xff] (%p599_p3), %v161_v0 }
  0x11   : > { %164 = vst [vmem:[%s127_s25 + $0x8] sm:$0xff] %v163_v1 }
  0x12 PF: > { %170 = sbr.rel (!%p599_p3) target bundleno = 24 (0x18), region = 58  ;;  %s172_s26 = sand.u32 (%p599_p3), 1, %s537_s10  }
  0x13   : > { %s454_s27 = sshll.u32 (%p599_p3), %s545_s12, 3  ;;  %s453_s28 = sshll.u32 (%p599_p3), %s172_s26, 4 }
  0x14   : > { %s177_s3 = scalar_lea.vmem (%p599_p3), %s651_s1, %s454_s27  ;;  %s174_s4 = scalar_lea.vmem (%p599_p3), [#allocation4], %s453_s28 }
  0x15   : > { %v208_v2 = vld [vmem:[%s177_s3] sm:$0xff] (%p599_p3)  ;;  %v210_v3 = vld [vmem:[%s177_s3 + $0x10] sm:$0xff] (%p599_p3) }
  0x16   : > { %209 = vst [vmem:[%s174_s4] sm:$0xff] (%p599_p3), %v208_v2 }
  0x17   : > { %211 = vst [vmem:[%s174_s4 + $0x8] sm:$0xff] %v210_v3 }
  0x18 PF: > { %p455_p6 = scmp.ge.s32.totalorder %s549_s13, 1  ;;  %p216_p7 = scmp.lt.s32.totalorder %s549_s13, 3 }
  0x1a   : > { %p217_p8 = pnand %p455_p6, %p216_p7 }
  0x1b   : > { %s223_s5 = sand.u32 (!%p217_p8), 1, %s533_s9   ;;  %s458_s9 = sshll.u32 (!%p217_p8), %s541_s11, 7 }
  0x1c   : > { %220 = sbr.rel (%p217_p8) target bundleno = 213 (0xd5), region = 96  ;;  %s456_s6 = sshll.u32 (!%p217_p8), %s223_s5, 4 }
  0x1d   : > { %s225_s7 = scalar_lea.vmem (!%p217_p8), [#allocation3], %s456_s6  ;;  %s232_s8 = scalar_lea.vmem (!%p217_p8), [#allocation4], %s456_s6 }
  0x1e   : > { %p255_p9 = scmp.lt.s32.totalorder (!%p217_p8), %s541_s11, 1 }
  0x21   : > { %v551_v4 = vmov 0.0   ;;  %v265_v5 = vld [vmem:[%s225_s7 + $0x8] sm:$0x1f]  ;;  %v264_v6 = vld [vmem:[%s225_s7] sm:$0xff]  ;;  %v268_v13 = vlaneseq  ;;  %v325_v31 = vstv %s458_s9  ;;  %vm345_vm5 = vcmask 1044480   ;;  %s661_s11 = smov (!%p255_p9, %s541_s11), 1 }
  0x22   : > { %263 = vst [vmem:[#allocation2 + $0x8] sm:$0x1f] %v551_v4  ;;  %v300_v7 = vand.u32 2147483647, %v265_v5  ;;  %v299_v8 = vand.u32 2147483647, %v264_v6  ;;  %s257_s17 = scalar_lea.vmem %s652_s2, %s661_s11 }
  0x23   : > { %v266_v12 = vld [vmem:[%s232_s8] sm:$0xff]  ;;  %v267_v15 = vld [vmem:[%s232_s8 + $0x8] sm:$0x1f]  ;;  %v269_v16 = vshrl.u32 %v268_v13, 7  ;;  %v324_v28 = vand.u32 127, %v268_v13  ;;  %v294_v29 = vmax.f32 %v265_v5, 0.0 }
  0x24   : > { %v302_v9 = vsub.f32 0.0, %v300_v7  ;;  %v301_v10 = vsub.f32 0.0, %v299_v8  ;;  %v277_v17 = vfloor.f32 %v266_v12  ;;  %v279_v18 = vceil.f32 %v266_v12 }
  0x25   : > { %vm275_vm0 = vcmp.ge.f32.partialorder %v266_v12, 0.0  ;;  %v278_v19 = vfloor.f32 %v267_v15  ;;  %v280_v20 = vceil.f32 %v267_v15  ;;  %vm276_vm1 = vcmp.ge.f32.partialorder %v267_v15, 0.0 }
  0x26   : > { %v305_v11 = vmul.f32 1.442695, %v302_v9  ;;  %v303_v14 = vmul.f32 1.442695, %v301_v10  ;;  %vm273_vm2 = vcmp.ge.s32.totalorder %v269_v16, 5  ;;  %v281_v21 = vsel %vm275_vm0, %v277_v17, %v279_v18 }
  0x27   : > { %v282_v24 = vsel %vm276_vm1, %v278_v19, %v280_v20  ;;  %v287_v26 = vsel %vm273_vm2, %v281_v21, %v266_v12  ;;  %v293_v32 = vmax.f32 %v264_v6, 0.0  ;;  %v326_v34 = vadd.s32 %v325_v31, %v324_v28 }
  0x28   : > { %503 = vpow2.f32 %v305_v11  ;;  %v296_v30 = vmul.f32 %v282_v24, %v265_v5  ;;  %v295_v33 = vmul.f32 %v287_v26, %v264_v6  ;;  %v289_v35 = vsub.f32 %v264_v6, %v266_v12 }
  0x29   : > { %505 = vpow2.f32 %v303_v14  ;;  %vm327_vm3 = vcmp.lt.s32.totalorder %v326_v34, 128  ;;  %v333_v44 = vld [vmem:[#allocation2 + $0x8] sm:$0x1f]  ;;  %vm271_vm4 = vcmp.lt.s32.totalorder %v269_v16, 4  ;;  %vm349_vm6 = vcmp.eq.s32.totalorder %v269_v16, 4 }
  0x2a   : > { %v298_v36 = vsub.f32 %v294_v29, %v296_v30  ;;  %v297_v38 = vsub.f32 %v293_v32, %v295_v33  ;;  %v291_v41 = vmul.f32 %v289_v35, %v289_v35  ;;  %v552_v53 = vmov 0.00048828125  }
  0x2b   : > { %v351_v54 = vsel %vm349_vm6, 0.0078125, %v552_v53 }
  0x2c   : > { %v353_v56 = vsel %vm271_vm4, 9.765625e-05, %v351_v54 }
  0x2e   : > { %v504_v22 = vpop.eup %503 }
  0x2f   : > { %v506_v23 = vpop.eup %505  ;;  %v308_v25 = vadd.f32 1.0, %v504_v22 }
  0x30   : > { %v307_v27 = vadd.f32 1.0, %v506_v23 }
  0x31   : > { %507 = vlog2.f32 %v308_v25 }
  0x32   : > { %509 = vlog2.f32 %v307_v27 }
  0x37   : > { %v508_v37 = vpop.eup %507 }
  0x38   : > { %v510_v39 = vpop.eup %509  ;;  %v312_v40 = vmul.f32 0.6931472, %v508_v37 }
  0x39   : > { %v310_v42 = vmul.f32 0.6931472, %v510_v39 }
  0x3a   : > { %v314_v43 = vadd.f32 %v312_v40, %v298_v36 }
  0x3b   : > { %v313_v45 = vadd.f32 %v310_v42, %v297_v38 }
  0x3c   : > { %v331_v46 = vsel %vm327_vm3, %v314_v43, 0.0 }
  0x3d   : > { %v335_v47 = vadd.f32 %v333_v44, %v331_v46  ;;  %v319_v48 = vsel %vm271_vm4, %v291_v41, %v313_v45 }
  0x3e   : > { %v330_v49 = vsel %vm327_vm3, %v319_v48, 0.0 }
  0x3f   : > { %337 = vst [vmem:[#allocation2 + $0x8] sm:$0x1f] %v335_v47 }
  0x46   : > { %v342_v50 = vld [vmem:[#allocation2 + $0x8] sm:$0x1f] }
  0x47   : > { %v346_v51 = vsel %vm345_vm5, %v342_v50, 0.0 }
  0x48   : > { %347 = vadd.xlane.f32.xlu0 %v346_v51 }
  0x50   : > { %343 = vadd.xlane.f32.xlu0 %v330_v49 }
  0xbb   : > { %v348_v52 = vpop.xlane.xlu0 %347 }
  0xbc   : > { %v356_v55 = vmul.f32 0.00048828125, %v348_v52 }
  0xbe   : > { %v357_v59 = vsel %vm345_vm5, %v356_v55, 0.0 }
  0xc3   : > { %v344_v57 = vpop.xlane.xlu0 %343 }
  0xc4   : > { %v355_v58 = vmul.f32 %v353_v56, %v344_v57 }
  0xc6   : > { %v358_v60 = vadd.f32 %v357_v59, %v355_v58 }
  0xc8   : > { %v359_v61 = vrot.slane %v358_v60, 4 }
  0xca   : > { %v360_v62 = vadd.f32 %v359_v61, %v358_v60 }
  0xcc   : > { %v361_v63 = vrot.slane %v360_v62, 2 }
  0xce   : > { %v362_v0 = vadd.f32 %v361_v63, %v360_v62 }
  0xd0   : > { %v363_v1 = vrot.slane %v362_v0, 1 }
  0xd2   : > { %v364_v2 = vadd.f32 %v363_v1, %v362_v0 }
  0xd4   : > { %365 = vst [vmem:[%s257_s17] sm:$0x1] %v364_v2 }
  0xd5 PF: > { %s12_s13 = sadd.s32 1, %s549_s13   ;;  %s654_s9 = smov %s537_s10 }
  0xd6   : > { %p9_p10 = scmp.ge.s32.totalorder %s12_s13, 4   ;;  %s655_s10 = smov %s607_s18 }
  0xd7   : > { %s656_s11 = smov %s545_s12  ;;  %s657_s12 = smov %s659_s14 }
  0xd8   :  { %11 = sbr.rel (!%p9_p10) target bundleno = 3 (0x3), region = 155 }

</bundles_post_ra>
